<compile_context>
chip_gen: v5e
topology: v5e:2x2
jax: 0.10.0
libtpu: 0.0.40
codegen_flags: <defaults>
</compile_context>

<pallas_src>
import functools

import jax
import jax.numpy as jnp
from jax.experimental import pallas as pl
from jax.experimental.pallas import tpu as pltpu

HIDDEN = 256     # fixed by the PyTorch module
_SUBLANE = 16    # bf16 sublane pack (also a multiple of the f32 sublane, 8)
_LANE = 128


def _round_up(n, m):
    return ((n + m - 1) // m) * m


def _tpu_info():
    """(vmem_capacity_bytes, two_tensorcores_per_chip) with safe fallbacks."""
    vmem_cap = 64 << 20          # conservative fallback: v7x has 64 MiB / TC
    two_cores = False
    try:
        vmem_cap = int(pltpu.get_tpu_info().vmem_capacity_bytes)
    except Exception:
        pass
    try:
        kind = (getattr(jax.devices()[0], "device_kind", "") or "").lower()
        two_cores = ("v7" in kind) or ("tpu7" in kind)
    except Exception:
        pass
    return vmem_cap, two_cores


def mlp_kernel(x_ref, w1_ref, b1_ref, w2_ref, b2_ref, w3_ref, b3_ref, o_ref):
    """Fused fc1 -> ReLU -> fc2 -> ReLU -> fc3 for one batch tile.

    All matmuls run on the MXU with f32 accumulation; bias add + ReLU stay in
    f32 on the VPU. Dot inputs follow the weights' dtype (bf16 by default).
    """
    x = x_ref[...].astype(w1_ref.dtype)

    h1 = jnp.dot(x, w1_ref[...], preferred_element_type=jnp.float32) + b1_ref[...]
    h1 = jnp.maximum(h1, 0.0)

    h2 = jnp.dot(h1.astype(w2_ref.dtype), w2_ref[...],
                 preferred_element_type=jnp.float32) + b2_ref[...]
    h2 = jnp.maximum(h2, 0.0)

    out = jnp.dot(h2.astype(w3_ref.dtype), w3_ref[...],
                  preferred_element_type=jnp.float32) + b3_ref[...]
    o_ref[...] = out.astype(o_ref.dtype)


@functools.partial(jax.jit, static_argnames=("block_b", "mxu_dtype"))
def mlp_forward(x, params, *, block_b=512, mxu_dtype=jnp.bfloat16):
    """Runs the fused MLP kernel, tiling over the (padded) batch dimension."""
    w1, b1, w2, b2, w3, b3 = params
    B, D = x.shape
    H = w1.shape[1]
    C = w3.shape[1]
    out_dtype = x.dtype

    vmem_cap, two_cores = _tpu_info()

    # --- lane-dense output: pad num_classes up to a multiple of 128 ----------
    C_pad = _round_up(C, _LANE)
    if C_pad != C:
        w3 = jnp.pad(w3, ((0, 0), (0, C_pad - C)))
        b3 = jnp.pad(b3, ((0, 0), (0, C_pad - C)))

    # --- MXU dtype: cast the streamed activation AND the weights in the
    #     wrapper (halves the per-step x DMA); biases stay f32 so the
    #     bias-add / ReLU run in f32. ---------------------------------------
    x = x.astype(mxu_dtype)
    w1 = w1.astype(mxu_dtype)
    w2 = w2.astype(mxu_dtype)
    w3 = w3.astype(mxu_dtype)
    b1 = b1.astype(jnp.float32)
    b2 = b2.astype(jnp.float32)
    b3 = b3.astype(jnp.float32)

    x_item = jnp.dtype(mxu_dtype).itemsize
    out_item = jnp.dtype(out_dtype).itemsize
    weight_bytes = (D * H + H * H + H * C_pad) * x_item + (H + H + C_pad) * 4

    # --- batch tile selection ------------------------------------------------
    if B <= 128:
        # Small batches: sublane-granular only (MXU handles M < 128 fine).
        bb = _round_up(B, _SUBLANE)
    else:
        bb = _round_up(min(block_b, _round_up(B, 256)), 256)

    # v7x has 2 TensorCores and "parallel" shards the grid axis across them:
    # make sure there are at least 2 grid steps when the batch allows it.
    if two_cores and pl.cdiv(B, bb) < 2 and bb > _SUBLANE:
        bb = max(_SUBLANE, _round_up(bb // 2, _SUBLANE))

    def _vmem_needed(tile):
        return (2 * tile * D * x_item            # double-buffered x tile
                + 2 * tile * C_pad * out_item    # double-buffered out tile
                + 2 * weight_bytes               # resident weights (worst case 2x)
                + (4 << 20))                     # h1/h2 + compiler scratch slack

    # Shrink the tile until it fits the per-generation VMEM budget.
    while _vmem_needed(bb) > 0.8 * vmem_cap and bb > _SUBLANE:
        bb = max(_SUBLANE, _round_up(bb // 2, _SUBLANE))

    B_pad = _round_up(B, bb)
    if B_pad != B:
        x = jnp.pad(x, ((0, B_pad - B), (0, 0)))

    grid = (B_pad // bb,)
    vmem_limit = int(min(vmem_cap, max(_vmem_needed(bb), 32 << 20)))

    # Weights/biases are small -> one full block, constant across grid steps.
    full = lambda shape: pl.BlockSpec(shape, lambda i: (0, 0))

    flops = 2 * B_pad * (D * H + H * H + H * C_pad)
    bytes_accessed = (
        B_pad * D * x_item                 # streamed x (mxu_dtype)
        + B_pad * C_pad * out_item         # streamed output (out_dtype)
        + weight_bytes                     # resident weights / biases
    )

    out = pl.pallas_call(
        mlp_kernel,
        out_shape=jax.ShapeDtypeStruct((B_pad, C_pad), out_dtype),
        grid_spec=pltpu.PrefetchScalarGridSpec(
            num_scalar_prefetch=0,
            grid=grid,
            in_specs=[
                pl.BlockSpec((bb, D), lambda i: (i, 0)),   # x tile (K unpadded)
                full(w1.shape), full(b1.shape),            # fc1
                full(w2.shape), full(b2.shape),            # fc2
                full(w3.shape), full(b3.shape),            # fc3 (N padded to 128)
            ],
            out_specs=pl.BlockSpec((bb, C_pad), lambda i: (i, 0)),
        ),
        compiler_params=pltpu.CompilerParams(
            dimension_semantics=("parallel",),
            vmem_limit_bytes=vmem_limit,
        ),
        cost_estimate=pl.CostEstimate(
            flops=flops, transcendentals=0, bytes_accessed=bytes_accessed
        ),
    )(x, w1, b1, w2, b2, w3, b3)

    # Strip batch / class padding.
    return out[:B, :C]


def init_mlp_params(key, input_size, num_classes, dtype=jnp.float32):
    """Deterministic synthetic init (shapes match the nn.Linear layers)."""
    k1, k2, k3, k4, k5, k6 = jax.random.split(key, 6)

    def lin_init(kw, kb, fan_in, fan_out):
        # Mimic PyTorch's uniform(-1/sqrt(fan_in), 1/sqrt(fan_in)) init.
        bound = 1.0 / jnp.sqrt(jnp.asarray(fan_in, dtype))
        w = jax.random.uniform(kw, (fan_in, fan_out), dtype, -bound, bound)
        b = jax.random.uniform(kb, (1, fan_out), dtype, -bound, bound)
        return w, b

    w1, b1 = lin_init(k1, k2, input_size, HIDDEN)
    w2, b2 = lin_init(k3, k4, HIDDEN, HIDDEN)
    w3, b3 = lin_init(k5, k6, HIDDEN, num_classes)
    return (w1, b1, w2, b2, w3, b3)


def mlp_reference(x, params):
    """Plain-JAX f32 reference for correctness checking."""
    w1, b1, w2, b2, w3, b3 = params
    h1 = jnp.maximum(x @ w1 + b1, 0.0)
    h2 = jnp.maximum(h1 @ w2 + b2, 0.0)
    return h2 @ w3 + b3


if __name__ == "__main__":
    key = jax.random.PRNGKey(0)
    k_param, k_x = jax.random.split(key)

    batch = 16
    input_size = 32
    num_classes = 8

    params = init_mlp_params(k_param, input_size, num_classes)
    x = jax.random.normal(k_x, (batch, input_size), jnp.float32)

    # Default (fast) bf16-MXU path: f32 accumulation, bf16 inputs/weights.
    out = mlp_forward(x, params)
    out = jax.block_until_ready(out)

    ref = mlp_reference(x, params)
    assert out.shape == (batch, num_classes)
    assert out.dtype == jnp.float32
    # bf16 MXU inputs + f32 accumulation -> compare with a bf16-level tolerance.
    assert jnp.allclose(out, ref, atol=3e-2, rtol=3e-2), "bf16 mismatch vs reference"

    # f32 MXU path retains the tight tolerance.
    out_f32 = jax.block_until_ready(mlp_forward(x, params, mxu_dtype=jnp.float32))
    assert jnp.allclose(out_f32, ref, atol=1e-4, rtol=1e-4), "f32 mismatch vs reference"

    print("KERNEL_OK")
</pallas_src>

<mosaic_0001>
module attributes {stable_mosaic.version = 11 : i64} {
  func.func @mlp_kernel(%arg0: i32, %arg1: memref<16x32xbf16, #tpu.memory_space<vmem>>, %arg2: memref<32x256xbf16, #tpu.memory_space<vmem>>, %arg3: memref<1x256xf32, #tpu.memory_space<vmem>>, %arg4: memref<256x256xbf16, #tpu.memory_space<vmem>>, %arg5: memref<1x256xf32, #tpu.memory_space<vmem>>, %arg6: memref<256x128xbf16, #tpu.memory_space<vmem>>, %arg7: memref<1x128xf32, #tpu.memory_space<vmem>>, %arg8: memref<16x128xf32, #tpu.memory_space<vmem>>) attributes {dimension_semantics = [#tpu.dimension_semantics<parallel>], iteration_bounds = array<i64: 1>, scalar_prefetch = 0 : i64, scratch_operands = 0 : i64, tpu.core_type = #tpu.core_type<tc>, window_params = [{transform_indices = @transform_0, window_bounds = array<i64: 16, 32>}, {pipeline_mode = #tpu.pipeline_mode<synchronous>, transform_indices = @transform_1, window_bounds = array<i64: 32, 256>}, {pipeline_mode = #tpu.pipeline_mode<synchronous>, transform_indices = @transform_2, window_bounds = array<i64: 1, 256>}, {pipeline_mode = #tpu.pipeline_mode<synchronous>, transform_indices = @transform_3, window_bounds = array<i64: 256, 256>}, {pipeline_mode = #tpu.pipeline_mode<synchronous>, transform_indices = @transform_4, window_bounds = array<i64: 1, 256>}, {pipeline_mode = #tpu.pipeline_mode<synchronous>, transform_indices = @transform_5, window_bounds = array<i64: 256, 128>}, {pipeline_mode = #tpu.pipeline_mode<synchronous>, transform_indices = @transform_6, window_bounds = array<i64: 1, 128>}, {transform_indices = @transform_7, window_bounds = array<i64: 16, 128>}]} {
    %c0 = arith.constant 0 : index
    %c0_0 = arith.constant 0 : index
    %0 = vector.load %arg1[%c0, %c0_0] : memref<16x32xbf16, #tpu.memory_space<vmem>>, vector<16x32xbf16>
    %c0_1 = arith.constant 0 : index
    %c0_2 = arith.constant 0 : index
    %1 = vector.load %arg2[%c0_1, %c0_2] : memref<32x256xbf16, #tpu.memory_space<vmem>>, vector<32x256xbf16>
    %cst = arith.constant dense<0.000000e+00> : vector<16x256xf32>
    %2 = tpu.matmul %0, %1, %cst {dimension_numbers = #tpu.dot_dimension_numbers<[1], [0], [0], [1], [0, 0, 1, 1], [], []>} : vector<16x32xbf16>, vector<32x256xbf16>, vector<16x256xf32> -> vector<16x256xf32>
    %c0_3 = arith.constant 0 : index
    %c0_4 = arith.constant 0 : index
    %3 = vector.load %arg3[%c0_3, %c0_4] : memref<1x256xf32, #tpu.memory_space<vmem>>, vector<1x256xf32>
    %4 = vector.broadcast %3 : vector<1x256xf32> to vector<16x256xf32>
    %5 = arith.addf %2, %4 : vector<16x256xf32>
    %cst_5 = arith.constant 0.000000e+00 : f32
    %6 = vector.broadcast %cst_5 : f32 to vector<16x256xf32>
    %7 = arith.maximumf %5, %6 : vector<16x256xf32>
    %8 = arith.truncf %7 : vector<16x256xf32> to vector<16x256xbf16>
    %c0_6 = arith.constant 0 : index
    %c0_7 = arith.constant 0 : index
    %9 = vector.load %arg4[%c0_6, %c0_7] : memref<256x256xbf16, #tpu.memory_space<vmem>>, vector<256x256xbf16>
    %cst_8 = arith.constant dense<0.000000e+00> : vector<16x256xf32>
    %10 = tpu.matmul %8, %9, %cst_8 {dimension_numbers = #tpu.dot_dimension_numbers<[1], [0], [0], [1], [0, 0, 1, 1], [], []>} : vector<16x256xbf16>, vector<256x256xbf16>, vector<16x256xf32> -> vector<16x256xf32>
    %c0_9 = arith.constant 0 : index
    %c0_10 = arith.constant 0 : index
    %11 = vector.load %arg5[%c0_9, %c0_10] : memref<1x256xf32, #tpu.memory_space<vmem>>, vector<1x256xf32>
    %12 = vector.broadcast %11 : vector<1x256xf32> to vector<16x256xf32>
    %13 = arith.addf %10, %12 : vector<16x256xf32>
    %cst_11 = arith.constant 0.000000e+00 : f32
    %14 = vector.broadcast %cst_11 : f32 to vector<16x256xf32>
    %15 = arith.maximumf %13, %14 : vector<16x256xf32>
    %16 = arith.truncf %15 : vector<16x256xf32> to vector<16x256xbf16>
    %c0_12 = arith.constant 0 : index
    %c0_13 = arith.constant 0 : index
    %17 = vector.load %arg6[%c0_12, %c0_13] : memref<256x128xbf16, #tpu.memory_space<vmem>>, vector<256x128xbf16>
    %cst_14 = arith.constant dense<0.000000e+00> : vector<16x128xf32>
    %18 = tpu.matmul %16, %17, %cst_14 {dimension_numbers = #tpu.dot_dimension_numbers<[1], [0], [0], [1], [0, 0, 1, 1], [], []>} : vector<16x256xbf16>, vector<256x128xbf16>, vector<16x128xf32> -> vector<16x128xf32>
    %c0_15 = arith.constant 0 : index
    %c0_16 = arith.constant 0 : index
    %19 = vector.load %arg7[%c0_15, %c0_16] : memref<1x128xf32, #tpu.memory_space<vmem>>, vector<1x128xf32>
    %20 = vector.broadcast %19 : vector<1x128xf32> to vector<16x128xf32>
    %21 = arith.addf %18, %20 : vector<16x128xf32>
    %c0_17 = arith.constant 0 : index
    %c0_18 = arith.constant 0 : index
    %22 = vector.load %arg8[%c0_17, %c0_18] : memref<16x128xf32, #tpu.memory_space<vmem>>, vector<16x128xf32>
    tpu.vector_store %arg8[%c0_17, %c0_18], %21 {strides = array<i32>} : memref<16x128xf32, #tpu.memory_space<vmem>>, vector<16x128xf32>,
    return
  }
  func.func @transform_0(%arg0: i32) -> (i32, i32) {
    %c0_i32 = arith.constant 0 : i32
    %c0_i32_0 = arith.constant 0 : i32
    return %arg0, %c0_i32 : i32, i32
  }
  func.func @transform_1(%arg0: i32) -> (i32, i32) {
    %c0_i32 = arith.constant 0 : i32
    %c0_i32_0 = arith.constant 0 : i32
    %c0_i32_1 = arith.constant 0 : i32
    return %c0_i32, %c0_i32_0 : i32, i32
  }
  func.func @transform_2(%arg0: i32) -> (i32, i32) {
    %c0_i32 = arith.constant 0 : i32
    %c0_i32_0 = arith.constant 0 : i32
    %c0_i32_1 = arith.constant 0 : i32
    return %c0_i32, %c0_i32_0 : i32, i32
  }
  func.func @transform_3(%arg0: i32) -> (i32, i32) {
    %c0_i32 = arith.constant 0 : i32
    %c0_i32_0 = arith.constant 0 : i32
    %c0_i32_1 = arith.constant 0 : i32
    return %c0_i32, %c0_i32_0 : i32, i32
  }
  func.func @transform_4(%arg0: i32) -> (i32, i32) {
    %c0_i32 = arith.constant 0 : i32
    %c0_i32_0 = arith.constant 0 : i32
    %c0_i32_1 = arith.constant 0 : i32
    return %c0_i32, %c0_i32_0 : i32, i32
  }
  func.func @transform_5(%arg0: i32) -> (i32, i32) {
    %c0_i32 = arith.constant 0 : i32
    %c0_i32_0 = arith.constant 0 : i32
    %c0_i32_1 = arith.constant 0 : i32
    return %c0_i32, %c0_i32_0 : i32, i32
  }
  func.func @transform_6(%arg0: i32) -> (i32, i32) {
    %c0_i32 = arith.constant 0 : i32
    %c0_i32_0 = arith.constant 0 : i32
    %c0_i32_1 = arith.constant 0 : i32
    return %c0_i32, %c0_i32_0 : i32, i32
  }
  func.func @transform_7(%arg0: i32) -> (i32, i32) {
    %c0_i32 = arith.constant 0 : i32
    %c0_i32_0 = arith.constant 0 : i32
    return %arg0, %c0_i32 : i32, i32
  }
}

</mosaic_0001>

<bundles_post_ra>
// kernel: mlp_forward.1
= control target key start
LH: loop header
LB: loop body
LE: loop exit
PB: predicated region body
PF: predicated region fallthrough
CT: control target
= control target key end

     0   :  { %vm64_vm0 = vcmask 261120   ;;  %s1120_s1 = inlined_call_operand.vmem [shape: bf16[32,256], index: 1, kind: input, shape index: {}]   ;;  %s1121_s3 = inlined_call_operand.vmem [shape: bf16[256,256], index: 3, kind: input, shape index: {}]   ;;  %s1122_s0 = inlined_call_operand.vmem [shape: bf16[16,32], index: 0, kind: input, shape index: {}]   ;;  %s1123_s5 = inlined_call_operand.vmem [shape: bf16[256,128], index: 5, kind: input, shape index: {}]   ;;  %s1124_s2 = inlined_call_operand.vmem [shape: f32[1,256], index: 2, kind: input, shape index: {}]   ;;  %s1125_s4 = inlined_call_operand.vmem [shape: f32[1,256], index: 4, kind: input, shape index: {}]   ;;  %s1126_s6 = inlined_call_operand.vmem [shape: f32[1,128], index: 6, kind: input, shape index: {}]   ;;  %s1127_s7 = inlined_call_operand.vmem [shape: f32[16,128], index: 7, kind: output, shape index: {}]  }
   0x1   :  { %v542_v0 = vld [vmem:[%s1120_s1 + $0x10] sm:$0xf]  ;;  %v746_v1 = vld [vmem:[%s1120_s1 + $0x14] sm:$0xf0]  ;;  %v745_v2 = vld [vmem:[%s1120_s1 + $0x14] sm:$0xf] }
   0x2   :  { %v543_v3 = vor.u32 %v746_v1, %v542_v0  ;;  %v544_v4 = vld [vmem:[%s1120_s1 + $0x18] sm:$0xf0]  ;;  %v534_v5 = vld [vmem:[%s1120_s1] sm:$0xf]  ;;  %v744_v6 = vld [vmem:[%s1120_s1 + $0x4] sm:$0xf0] }
   0x3   :  { %v547_v7 = vor.u32 %v745_v2, %v544_v4  ;;  %v743_v8 = vld [vmem:[%s1120_s1 + $0x4] sm:$0xf]  ;;  %v536_v9 = vld [vmem:[%s1120_s1 + $0x8] sm:$0xf0]  ;;  %v535_v10 = vor.u32 %v744_v6, %v534_v5  ;;  %v608_v11 = vld [vmem:[%s1121_s3 + $0x70] sm:$0xf] }
   0x4   :  { %74 = vmatpush.bf16.msra.mxu0 %v543_v3  ;;  %v762_v12 = vld [vmem:[%s1121_s3 + $0x74] sm:$0xf0]  ;;  %v672_v13 = vld [vmem:[%s1121_s3 + $0xf0] sm:$0xf]  ;;  %v539_v14 = vor.u32 %v743_v8, %v536_v9  ;;  %v742_v15 = vld [vmem:[%s1122_s0] sm:$0xff] }
   0x5   :  { %88 = vmatpush.bf16.msra.mxu1 %v547_v7  ;;  %v609_v16 = vor.u32 %v762_v12, %v608_v11  ;;  %v778_v17 = vld [vmem:[%s1121_s3 + $0xf4] sm:$0xf0]  ;;  %v761_v18 = vld [vmem:[%s1121_s3 + $0x74] sm:$0xf]  ;;  %v610_v19 = vld [vmem:[%s1121_s3 + $0x78] sm:$0xf0] }
   0x6   :  { %v673_v20 = vor.u32 %v778_v17, %v672_v13  ;;  %v613_v21 = vor.u32 %v761_v18, %v610_v19  ;;  %v777_v22 = vld [vmem:[%s1121_s3 + $0xf4] sm:$0xf]  ;;  %v674_v23 = vld [vmem:[%s1121_s3 + $0xf8] sm:$0xf0]  ;;  %v600_v24 = vld [vmem:[%s1121_s3 + $0x60] sm:$0xf] }
   0x7   :  { %300 = vmatpush.bf16.msra.mxu2 %v609_v16  ;;  %v677_v25 = vor.u32 %v777_v22, %v674_v23  ;;  %v760_v26 = vld [vmem:[%s1121_s3 + $0x64] sm:$0xf0]  ;;  %v664_v27 = vld [vmem:[%s1121_s3 + $0xe0] sm:$0xf]  ;;  %v759_v31 = vld [vmem:[%s1121_s3 + $0x64] sm:$0xf] }
   0x8   :  { %v776_v28 = vld [vmem:[%s1121_s3 + $0xe4] sm:$0xf0]  ;;  %75 = vmatpush.bf16.msra.mxu0 %v535_v10  ;;  %314 = vmatpush.bf16.msra.mxu3 %v673_v20  ;;  %v601_v29 = vor.u32 %v760_v26, %v600_v24  ;;  %v602_v32 = vld [vmem:[%s1121_s3 + $0x68] sm:$0xf0]  ;;  %v775_v33 = vld [vmem:[%s1121_s3 + $0xe4] sm:$0xf] }
   0x9   :  { %v665_v30 = vor.u32 %v776_v28, %v664_v27  ;;  %89 = vmatpush.bf16.msra.mxu1 %v539_v14  ;;  %v605_v34 = vor.u32 %v759_v31, %v602_v32  ;;  %v666_v35 = vld [vmem:[%s1121_s3 + $0xe8] sm:$0xf0]  ;;  %v592_v36 = vld [vmem:[%s1121_s3 + $0x50] sm:$0xf]  ;;  %v758_v37 = vld [vmem:[%s1121_s3 + $0x54] sm:$0xf0] }
   0xa   :  { %v669_v38 = vor.u32 %v775_v33, %v666_v35  ;;  %v656_v39 = vld [vmem:[%s1121_s3 + $0xd0] sm:$0xf]  ;;  %v774_v40 = vld [vmem:[%s1121_s3 + $0xd4] sm:$0xf0]  ;;  %v757_v41 = vld [vmem:[%s1121_s3 + $0x54] sm:$0xf]  ;;  %v593_v42 = vor.u32 %v758_v37, %v592_v36 }
   0xb   :  { %548 = vmatmul.msk.bf16.vlgmr.msra.gmra.mxu0 %vm64_vm0, %v742_v15  ;;  %301 = vmatpush.bf16.msra.mxu2 %v601_v29  ;;  %v594_v43 = vld [vmem:[%s1121_s3 + $0x58] sm:$0xf0]  ;;  %v773_v44 = vld [vmem:[%s1121_s3 + $0xd4] sm:$0xf]  ;;  %v657_v46 = vor.u32 %v774_v40, %v656_v39  ;;  %v584_v47 = vld [vmem:[%s1121_s3 + $0x40] sm:$0xf] }
   0xc   :  { %328 = vmatpush.bf16.msrb.mxu0 %v613_v21  ;;  %v658_v45 = vld [vmem:[%s1121_s3 + $0xd8] sm:$0xf0]  ;;  %549 = vmatmul.msk.bf16.vlgmr.msra.gmra.mxu1 %vm64_vm0, %v742_v15  ;;  %v756_v48 = vld [vmem:[%s1121_s3 + $0x44] sm:$0xf0]  ;;  %v597_v49 = vor.u32 %v757_v41, %v594_v43  ;;  %v648_v50 = vld [vmem:[%s1121_s3 + $0xc0] sm:$0xf] }
   0xd   :  { %342 = vmatpush.bf16.msrb.mxu1 %v677_v25  ;;  %315 = vmatpush.bf16.msra.mxu3 %v665_v30  ;;  %v772_v51 = vld [vmem:[%s1121_s3 + $0xc4] sm:$0xf0]  ;;  %v661_v52 = vor.u32 %v773_v44, %v658_v45  ;;  %v755_v53 = vld [vmem:[%s1121_s3 + $0x44] sm:$0xf]  ;;  %v586_v54 = vld [vmem:[%s1121_s3 + $0x48] sm:$0xf0]  ;;  %v585_v55 = vor.u32 %v756_v48, %v584_v47 }
   0xe   :  { %v771_v56 = vld [vmem:[%s1121_s3 + $0xc4] sm:$0xf]  ;;  %v650_v57 = vld [vmem:[%s1121_s3 + $0xc8] sm:$0xf0]  ;;  %v649_v58 = vor.u32 %v772_v51, %v648_v50  ;;  %v589_v59 = vor.u32 %v755_v53, %v586_v54  ;;  %v576_v61 = vld [vmem:[%s1121_s3 + $0x30] sm:$0xf] }
   0xf   :  { %302 = vmatpush.bf16.msra.mxu2 %v593_v42  ;;  %v653_v60 = vor.u32 %v771_v56, %v650_v57  ;;  %v754_v62 = vld [vmem:[%s1121_s3 + $0x34] sm:$0xf0]  ;;  %v640_v63 = vld [vmem:[%s1121_s3 + $0xb0] sm:$0xf]  ;;  %v753_v2 = vld [vmem:[%s1121_s3 + $0x34] sm:$0xf] }
  0x10   :  { %329 = vmatpush.bf16.msrb.mxu0 %v605_v34  ;;  %v577_v0 = vor.u32 %v754_v62, %v576_v61  ;;  %v770_v1 = vld [vmem:[%s1121_s3 + $0xb4] sm:$0xf0]  ;;  %v578_v3 = vld [vmem:[%s1121_s3 + $0x38] sm:$0xf0]  ;;  %v769_v6 = vld [vmem:[%s1121_s3 + $0xb4] sm:$0xf] }
  0x11   :  { %343 = vmatpush.bf16.msrb.mxu1 %v669_v38  ;;  %316 = vmatpush.bf16.msra.mxu3 %v657_v46  ;;  %v641_v4 = vor.u32 %v770_v1, %v640_v63  ;;  %v581_v5 = vor.u32 %v753_v2, %v578_v3  ;;  %v642_v7 = vld [vmem:[%s1121_s3 + $0xb8] sm:$0xf0]  ;;  %v568_v9 = vld [vmem:[%s1121_s3 + $0x20] sm:$0xf]  ;;  %v752_v10 = vld [vmem:[%s1121_s3 + $0x24] sm:$0xf0] }
  0x12   :  { %v645_v8 = vor.u32 %v769_v6, %v642_v7  ;;  %v569_v11 = vor.u32 %v752_v10, %v568_v9  ;;  %v632_v12 = vld [vmem:[%s1121_s3 + $0xa0] sm:$0xf]  ;;  %v768_v13 = vld [vmem:[%s1121_s3 + $0xa4] sm:$0xf0]  ;;  %v751_v14 = vld [vmem:[%s1121_s3 + $0x24] sm:$0xf] }
  0x13   :  { %303 = vmatpush.bf16.msra.mxu2 %v585_v55  ;;  %v633_v15 = vor.u32 %v768_v13, %v632_v12  ;;  %v570_v16 = vld [vmem:[%s1121_s3 + $0x28] sm:$0xf0]  ;;  %v767_v17 = vld [vmem:[%s1121_s3 + $0xa4] sm:$0xf]  ;;  %v560_v21 = vld [vmem:[%s1121_s3 + $0x10] sm:$0xf] }
  0x14   :  { %330 = vmatpush.bf16.msrb.mxu0 %v597_v49  ;;  %v634_v18 = vld [vmem:[%s1121_s3 + $0xa8] sm:$0xf0]  ;;  %v573_v19 = vor.u32 %v751_v14, %v570_v16  ;;  %v750_v22 = vld [vmem:[%s1121_s3 + $0x14] sm:$0xf0]  ;;  %v624_v23 = vld [vmem:[%s1121_s3 + $0x90] sm:$0xf] }
  0x15   :  { %344 = vmatpush.bf16.msrb.mxu1 %v661_v52  ;;  %317 = vmatpush.bf16.msra.mxu3 %v649_v58  ;;  %v637_v20 = vor.u32 %v767_v17, %v634_v18  ;;  %v561_v24 = vor.u32 %v750_v22, %v560_v21  ;;  %v766_v25 = vld [vmem:[%s1121_s3 + $0x94] sm:$0xf0]  ;;  %v749_v26 = vld [vmem:[%s1121_s3 + $0x14] sm:$0xf]  ;;  %v562_v27 = vld [vmem:[%s1121_s3 + $0x18] sm:$0xf0] }
  0x16   :  { %v625_v28 = vor.u32 %v766_v25, %v624_v23  ;;  %v565_v29 = vor.u32 %v749_v26, %v562_v27  ;;  %v765_v30 = vld [vmem:[%s1121_s3 + $0x94] sm:$0xf]  ;;  %v626_v31 = vld [vmem:[%s1121_s3 + $0x98] sm:$0xf0]  ;;  %v552_v33 = vld [vmem:[%s1121_s3] sm:$0xf] }
  0x17   :  { %304 = vmatpush.bf16.msra.mxu2 %v577_v0  ;;  %v629_v32 = vor.u32 %v765_v30, %v626_v31  ;;  %v748_v34 = vld [vmem:[%s1121_s3 + $0x4] sm:$0xf0]  ;;  %v616_v35 = vld [vmem:[%s1121_s3 + $0x80] sm:$0xf]  ;;  %v747_v38 = vld [vmem:[%s1121_s3 + $0x4] sm:$0xf] }
  0x18   :  { %331 = vmatpush.bf16.msrb.mxu0 %v589_v59  ;;  %v553_v36 = vor.u32 %v748_v34, %v552_v33  ;;  %v764_v37 = vld [vmem:[%s1121_s3 + $0x84] sm:$0xf0]  ;;  %v554_v39 = vld [vmem:[%s1121_s3 + $0x8] sm:$0xf0]  ;;  %v763_v42 = vld [vmem:[%s1121_s3 + $0x84] sm:$0xf] }
  0x19   :  { %345 = vmatpush.bf16.msrb.mxu1 %v653_v60  ;;  %318 = vmatpush.bf16.msra.mxu3 %v641_v4  ;;  %v617_v40 = vor.u32 %v764_v37, %v616_v35  ;;  %v557_v41 = vor.u32 %v747_v38, %v554_v39  ;;  %v618_v43 = vld [vmem:[%s1121_s3 + $0x88] sm:$0xf0]  ;;  %v794_v45 = vld [vmem:[%s1123_s5 + $0x78] sm:$0xff]  ;;  %v793_v47 = vld [vmem:[%s1123_s5 + $0x70] sm:$0xff] }
  0x1a   :  { %v621_v44 = vor.u32 %v763_v42, %v618_v43  ;;  %v786_v46 = vld [vmem:[%s1123_s5 + $0x38] sm:$0xff]  ;;  %v785_v48 = vld [vmem:[%s1123_s5 + $0x30] sm:$0xff]  ;;  %v792_v49 = vld [vmem:[%s1123_s5 + $0x68] sm:$0xff] }
  0x1b   :  { %305 = vmatpush.bf16.msra.mxu2 %v569_v11  ;;  %v791_v50 = vld [vmem:[%s1123_s5 + $0x60] sm:$0xff]  ;;  %v784_v4 = vld [vmem:[%s1123_s5 + $0x28] sm:$0xff]  ;;  %v789_v7 = vld [vmem:[%s1123_s5 + $0x50] sm:$0xff] }
  0x1c   :  { %332 = vmatpush.bf16.msrb.mxu0 %v581_v5  ;;  %v33_v51 = vld [vmem:[%s1124_s2] sm:$0x3]  ;;  %v790_v5 = vld [vmem:[%s1123_s5 + $0x58] sm:$0xff]  ;;  %v788_v9 = vld [vmem:[%s1123_s5 + $0x48] sm:$0xff] }
  0x1d   :  { %346 = vmatpush.bf16.msrb.mxu1 %v645_v8  ;;  %319 = vmatpush.bf16.msra.mxu3 %v633_v15  ;;  %v35_v54 = vperm.slane %v33_v51, 0  ;;  %v36_v55 = vperm.slane %v33_v51, 1  ;;  %v783_v6 = vld [vmem:[%s1123_s5 + $0x20] sm:$0xff]  ;;  %v782_v8 = vld [vmem:[%s1123_s5 + $0x18] sm:$0xff]  ;;  %v781_v10 = vld [vmem:[%s1123_s5 + $0x10] sm:$0xff] }
  0x1e   :  { %v787_v11 = vld [vmem:[%s1123_s5 + $0x40] sm:$0xff]  ;;  %v780_v12 = vld [vmem:[%s1123_s5 + $0x8] sm:$0xff] }
  0x1f   :  { %306 = vmatpush.bf16.msra.mxu2 %v561_v24  ;;  %v779_v13 = vld [vmem:[%s1123_s5] sm:$0xff] }
  0x20   :  { %333 = vmatpush.bf16.msrb.mxu0 %v573_v19  ;;  %v134_v14 = vld [vmem:[%s1125_s4] sm:$0x3] }
  0x21   :  { %347 = vmatpush.bf16.msrb.mxu1 %v637_v20  ;;  %320 = vmatpush.bf16.msra.mxu3 %v625_v28  ;;  %v137_v16 = vperm.slane %v134_v14, 1  ;;  %v136_v20 = vperm.slane %v134_v14, 0  ;;  %v795_v39 = vld [vmem:[%s1126_s6] ss:$0 sm:$0xff] }
  0x23   :  { %307 = vmatpush.bf16.msra.mxu2 %v553_v36 }
  0x24   :  { %334 = vmatpush.bf16.msrb.mxu0 %v565_v29 }
  0x25   :  { %348 = vmatpush.bf16.msrb.mxu1 %v629_v32  ;;  %321 = vmatpush.bf16.msra.mxu3 %v617_v40 }
  0x27   :  { %494 = vmatpush.bf16.msrb.mxu2 %v786_v46 }
  0x28   :  { %335 = vmatpush.bf16.msrb.mxu0 %v557_v41 }
  0x29   :  { %349 = vmatpush.bf16.msrb.mxu1 %v621_v44  ;;  %508 = vmatpush.bf16.msrb.mxu3 %v794_v45 }
  0x2b   :  { %495 = vmatpush.bf16.msrb.mxu2 %v785_v48 }
  0x2d   :  { %509 = vmatpush.bf16.msrb.mxu3 %v793_v47 }
  0x2f   :  { %496 = vmatpush.bf16.msrb.mxu2 %v784_v4 }
  0x31   :  { %510 = vmatpush.bf16.msrb.mxu3 %v792_v49 }
  0x33   :  { %497 = vmatpush.bf16.msrb.mxu2 %v783_v6 }
  0x35   :  { %511 = vmatpush.bf16.msrb.mxu3 %v791_v50 }
  0x37   :  { %498 = vmatpush.bf16.msrb.mxu2 %v782_v8 }
  0x39   :  { %512 = vmatpush.bf16.msrb.mxu3 %v790_v5 }
  0x3b   :  { %499 = vmatpush.bf16.msrb.mxu2 %v781_v10 }
  0x3d   :  { %513 = vmatpush.bf16.msrb.mxu3 %v789_v7 }
  0x3f   :  { %500 = vmatpush.bf16.msrb.mxu2 %v780_v12 }
  0x41   :  { %514 = vmatpush.bf16.msrb.mxu3 %v788_v9 }
  0x43   :  { %501 = vmatpush.bf16.msrb.mxu2 %v779_v13 }
  0x45   :  { %515 = vmatpush.bf16.msrb.mxu3 %v787_v11 }
  0x88   :  { %v77_v52 = vpop.f32.mrf.mxu0 }
  0x89   :  { %v91_v53 = vpop.f32.mrf.mxu1  ;;  %v78_v56 = vadd.f32 %v77_v52, %v35_v54 }
  0x8a   :  { %v92_v57 = vadd.f32 %v91_v53, %v36_v55 }
  0x8b   :  { %v96_v62 = vmax.f32 %v78_v56, 0.0 }
  0x8c   :  { %v97_v0 = vmax.f32 %v92_v57, 0.0 }
  0x90   :  { %v79_v58 = vpop.f32.mrf.mxu0 }
  0x91   :  { %v80_v59 = vadd.f32 %v79_v58, %v35_v54  ;;  %v93_v60 = vpop.f32.mrf.mxu1 }
  0x92   :  { %v94_v61 = vadd.f32 %v93_v60, %v36_v55 }
  0x93   :  { %v98_v63 = vmax.f32 %v80_v59, 0.0 }
  0x94   :  { %v99_v1 = vmax.f32 %v94_v61, 0.0 }
  0x95   :  { %v100_v2 = vpack.c.bf16 %v98_v63, %v96_v62 }
  0x96   :  { %v101_v3 = vpack.c.bf16 %v99_v1, %v97_v0 }
  0x97   :  { %308 = vmatmul.bf16.vlgmr.msra.gmra.mxu2 %v100_v2  ;;  %336 = vmatmul.bf16.vlgmr.msrb.gmra.mxu0 %v100_v2 }
  0x98   :  { %322 = vmatmul.bf16.vlgmr.msra.gmra.mxu3 %v101_v3  ;;  %350 = vmatmul.bf16.vlgmr.msrb.gmra.mxu1 %v101_v3 }
 0x114   :  { %v337_v15 = vpop.f32.mrf.mxu0 }
 0x115   :  { %v351_v17 = vpop.f32.mrf.mxu1  ;;  %v338_v18 = vadd.f32 %v337_v15, %v137_v16 }
 0x117   :  { %v352_v23 = vadd.f32 %v351_v17, %v338_v18 }
 0x119   :  { %v357_v28 = vmax.f32 %v352_v23, 0.0 }
 0x11a   :  { %v309_v19 = vpop.f32.mrf.mxu2 }
 0x11b   :  { %v323_v21 = vpop.f32.mrf.mxu3  ;;  %v310_v26 = vadd.f32 %v309_v19, %v136_v20 }
 0x11c   :  { %v339_v22 = vpop.f32.mrf.mxu0 }
 0x11d   :  { %v340_v24 = vadd.f32 %v339_v22, %v137_v16  ;;  %v353_v25 = vpop.f32.mrf.mxu1  ;;  %v324_v31 = vadd.f32 %v323_v21, %v310_v26 }
 0x11f   :  { %v354_v27 = vadd.f32 %v353_v25, %v340_v24  ;;  %v356_v36 = vmax.f32 %v324_v31, 0.0 }
 0x121   :  { %v359_v29 = vmax.f32 %v354_v27, 0.0 }
 0x122   :  { %v311_v30 = vpop.f32.mrf.mxu2 }
 0x123   :  { %v361_v32 = vpack.c.bf16 %v359_v29, %v357_v28  ;;  %v312_v33 = vadd.f32 %v311_v30, %v136_v20  ;;  %v325_v34 = vpop.f32.mrf.mxu3 }
 0x125   :  { %v326_v35 = vadd.f32 %v325_v34, %v312_v33  ;;  %516 = vmatmul.bf16.vlgmr.msrb.gmra.mxu3 %v361_v32 }
 0x127   :  { %v358_v37 = vmax.f32 %v326_v35, 0.0 }
 0x129   :  { %v360_v38 = vpack.c.bf16 %v358_v37, %v356_v36 }
 0x12b   :  { %502 = vmatmul.bf16.vlgmr.msrb.gmra.mxu2 %v360_v38 }
 0x1a8   :  { %v517_v40 = vpop.f32.mrf.mxu3 }
 0x1ae   :  { %v503_v41 = vpop.f32.mrf.mxu2 }
 0x1af   :  { %v504_v42 = vadd.f32 %v795_v39, %v503_v41 }
 0x1b0   :  { %v519_v46 = vpop.f32.mrf.mxu3 }
 0x1b1   :  { %v518_v43 = vadd.f32 %v517_v40, %v504_v42 }
 0x1b3   :  { %522 = vst [vmem:[%s1127_s7] sm:$0xff] %v518_v43 }
 0x1b6   :  { %v505_v44 = vpop.f32.mrf.mxu2 }
 0x1b7   :  { %v506_v45 = vadd.f32 %v795_v39, %v505_v44 }
 0x1b9   :  { %v520_v47 = vadd.f32 %v519_v46, %v506_v45 }
 0x1bb   :  { %523 = vst [vmem:[%s1127_s7 + $0x8] sm:$0xff] %v520_v47 }

</bundles_post_ra>
